<compile_context>
chip_gen: v7x
topology: tpu7x:2x2x1
jax: 0.10.0
libtpu: 0.0.40
codegen_flags: <defaults>
</compile_context>

<pallas_src>
import functools

import jax
import jax.numpy as jnp
from jax.experimental import pallas as pl
from jax.experimental.pallas import tpu as pltpu


def _round_up(x, m):
    return ((x + m - 1) // m) * m


def _device_kind():
    try:
        return jax.devices()[0].device_kind.lower()
    except Exception:
        return ""


# ------------------------------------------------------------------ kernels --

def _epilogue(y, out_ref, n):
    """Columns are [df (n) | 0.5*log_var (n) | mu (n) | zero-pad]; exp the first
    2N columns, pass the rest through, store one lane-dense row."""
    two_n = 2 * n
    if two_n % 128 == 0:
        # lane-aligned static split: exp only the columns that need it
        out_ref[:, :two_n] = jnp.exp(y[:, :two_n]).astype(out_ref.dtype)
        out_ref[:, two_n:] = y[:, two_n:].astype(out_ref.dtype)
    else:
        # single-compare mask fallback (still one wide unmasked store)
        col = jax.lax.broadcasted_iota(jnp.int32, y.shape, 1)
        out_ref[...] = jnp.where(col < two_n, jnp.exp(y), y).astype(out_ref.dtype)


def st_kernel(x_ref, w_ref, b_ref, out_ref, *, n, matmul_dtype):
    # single fused matmul over all three heads: (tb, I) @ (I, N3p) -> (tb, N3p)
    x = x_ref[...]
    if matmul_dtype is not None and x.dtype != matmul_dtype:
        x = x.astype(matmul_dtype)          # cast fused in-kernel (no extra HBM pass)
    y = jnp.dot(x, w_ref[...], preferred_element_type=jnp.float32) + b_ref[...]
    _epilogue(y, out_ref, n)


def st_kernel_ktiled(x_ref, w_ref, b_ref, out_ref, acc_ref, *, n, matmul_dtype):
    # K-tiled variant for large I: accumulate (tb, tk) @ (tk, N3p) over grid axis 1.
    k = pl.program_id(1)

    @pl.when(k == 0)
    def _():
        acc_ref[...] = jnp.zeros_like(acc_ref)

    x = x_ref[...]
    if matmul_dtype is not None and x.dtype != matmul_dtype:
        x = x.astype(matmul_dtype)
    acc_ref[...] += jnp.dot(x, w_ref[...], preferred_element_type=jnp.float32)

    @pl.when(k == pl.num_programs(1) - 1)
    def _():
        y = acc_ref[...] + b_ref[...]
        _epilogue(y, out_ref, n)


# ------------------------------------------------------------------ wrappers --

def st_prepare_params(w_df, b_df, w_mu, b_mu, w_lv, b_lv, *, matmul_dtype=None):
    """One-time parameter transform (call once at parameter-load time and cache).

    Weights are stored as [I, N] (transposed vs. PyTorch's [N, I]).
    Columns: [ df | 0.5*log_var | mu | zero-pad up to a multiple of 128 ].
    """
    I, N = w_df.shape
    n3 = 3 * N
    n3p = _round_up(n3, 128)
    w_cat = jnp.concatenate([w_df, 0.5 * w_lv, w_mu], axis=1)      # [I, 3N]
    b_cat = jnp.concatenate([b_df, 0.5 * b_lv, b_mu])              # [3N]
    if n3p > n3:
        w_cat = jnp.pad(w_cat, ((0, 0), (0, n3p - n3)))
        b_cat = jnp.pad(b_cat, (0, n3p - n3))
    b_cat = b_cat.reshape(1, n3p).astype(jnp.float32)              # bias added in f32
    if matmul_dtype is not None:
        w_cat = w_cat.astype(matmul_dtype)
    return w_cat, b_cat


def _choose_tb(B, row_cap, *, is_v7, matmul_bound, kind):
    """Largest batch tile dividing B that fits the pipelined-VMEM row budget.
    The 'keep >= 2 grid steps' split only applies on v7x (2 TensorCores)."""
    if B % 8 != 0 or B <= 8:
        return B
    cap = max(8, min(row_cap, B))
    if is_v7 and B >= 16:
        cap = min(cap, max(8, B // 2))
    if matmul_bound:
        align = 128 if "v5" in kind else 256      # MXU row granularity
        start = (cap // align) * align
        for t in range(start, align - 1, -align):
            if B % t == 0:
                return t
    start = max(8, (cap // 8) * 8)
    for t in range(start, 7, -8):
        if B % t == 0:
            return t
    return B


def st_apply(x, w_cat, b_cat, n, *, tb=None, matmul_dtype=None,
             out_dtype=jnp.float32, max_weight_bytes=None):
    """Fused Pallas call computing the StudentT parameters (df, mu, sigma)."""
    B, I = x.shape
    n3p = w_cat.shape[1]

    kind = _device_kind()
    is_v7 = "v7" in kind
    # generation-aware budgets: v7x has 64 MiB physical VMEM, v5e/v6e 128 MiB.
    tile_budget = (20 << 20) if is_v7 else (40 << 20)
    vmem_cap = (48 << 20) if is_v7 else (100 << 20)
    if max_weight_bytes is None:
        max_weight_bytes = tile_budget // 2

    w_item = jnp.dtype(w_cat.dtype).itemsize
    x_item = jnp.dtype(x.dtype).itemsize
    o_item = jnp.dtype(out_dtype).itemsize

    # decide whether the fused weight stays VMEM-resident or we K-tile over I
    tk = None
    w_bytes_full = 2 * I * n3p * w_item                      # double-buffered
    if w_bytes_full > max_weight_bytes:
        cand = (max_weight_bytes // (2 * n3p * w_item)) // 128 * 128
        cand = min(cand, (I // 128) * 128)
        for t in range(cand, 127, -128):
            if I % t == 0:
                tk = t
                break
    k_tiled = tk is not None and tk < I
    k_dim = tk if k_tiled else I

    resident = 2 * k_dim * n3p * w_item + 2 * 8 * n3p * 4    # weight + (padded) bias
    per_row = 2 * (k_dim * x_item + n3p * o_item)            # double-buffered x + out
    if k_tiled:
        per_row += n3p * 4                                   # f32 accumulator
    row_cap = max(8, (tile_budget - resident) // per_row)

    if tb is None:
        tb = _choose_tb(B, row_cap, is_v7=is_v7,
                        matmul_bound=(I >= 1024), kind=kind)
    assert B % tb == 0, "batch tile must divide B"
    assert tb == B or tb % 8 == 0, "batch tile must be a multiple of 8"

    vmem_limit = int(min(vmem_cap,
                         max(32 << 20, resident + tb * per_row + (2 << 20))))

    if not k_tiled:
        grid = (B // tb,)
        in_specs = [pl.BlockSpec((tb, I), lambda i: (i, 0)),
                    pl.BlockSpec((I, n3p), lambda i: (0, 0)),
                    pl.BlockSpec((1, n3p), lambda i: (0, 0))]
        out_specs = pl.BlockSpec((tb, n3p), lambda i: (i, 0))
        scratch = []
        kernel = functools.partial(st_kernel, n=n, matmul_dtype=matmul_dtype)
        dims = ("parallel",)
    else:
        grid = (B // tb, I // tk)
        in_specs = [pl.BlockSpec((tb, tk), lambda i, k: (i, k)),
                    pl.BlockSpec((tk, n3p), lambda i, k: (k, 0)),
                    pl.BlockSpec((1, n3p), lambda i, k: (0, 0))]
        out_specs = pl.BlockSpec((tb, n3p), lambda i, k: (i, 0))
        scratch = [pltpu.VMEM((tb, n3p), jnp.float32)]
        kernel = functools.partial(st_kernel_ktiled, n=n, matmul_dtype=matmul_dtype)
        dims = ("parallel", "arbitrary")

    out = pl.pallas_call(
        kernel,
        out_shape=jax.ShapeDtypeStruct((B, n3p), out_dtype),
        grid_spec=pltpu.PrefetchScalarGridSpec(
            num_scalar_prefetch=0,
            grid=grid,
            in_specs=in_specs,
            out_specs=out_specs,
            scratch_shapes=scratch),
        compiler_params=pltpu.CompilerParams(
            dimension_semantics=dims,
            vmem_limit_bytes=vmem_limit),
    )(x, w_cat, b_cat)

    df = out[:, :n]
    sigma = out[:, n:2 * n]
    mu = out[:, 2 * n:3 * n]
    # TODO(synk): torch.distributions.StudentT itself has no Pallas equivalent;
    # we return its parameters (df, loc=mu, scale=sigma).
    return df, mu, sigma


def st_forward(x, w_df, b_df, w_mu, b_mu, w_lv, b_lv, *, tb=None,
               matmul_dtype=None, out_dtype=jnp.float32, max_weight_bytes=None):
    # NOTE: in real use, call st_prepare_params once at parameter-load time and
    # cache (w_cat, b_cat); this wrapper rebuilds them only for the demo.
    n = w_df.shape[1]
    w_cat, b_cat = st_prepare_params(w_df, b_df, w_mu, b_mu, w_lv, b_lv,
                                     matmul_dtype=matmul_dtype)
    return st_apply(x, w_cat, b_cat, n, tb=tb, matmul_dtype=matmul_dtype,
                    out_dtype=out_dtype, max_weight_bytes=max_weight_bytes)


def reference_forward(x, w_df, b_df, w_mu, b_mu, w_lv, b_lv):
    df = jnp.exp(x @ w_df + b_df)
    mu = x @ w_mu + b_mu
    sigma = jnp.exp(0.5 * (x @ w_lv + b_lv))
    return df, mu, sigma


if __name__ == "__main__":
    key = jax.random.PRNGKey(0)

    def make_params(k, I, N):
        k1, k2, k3, k4, k5, k6 = jax.random.split(k, 6)
        s = 1.0 / jnp.sqrt(I)

        def u(kk, shape):
            return jax.random.uniform(kk, shape, minval=-s, maxval=s,
                                      dtype=jnp.float32)
        return (u(k1, (I, N)), u(k2, (N,)), u(k3, (I, N)), u(k4, (N,)),
                u(k5, (I, N)), u(k6, (N,)))

    # --- test 1: ST(i=32, n=32), f32 path (masked-epilogue branch) -----------
    B, I, N = 8, 32, 32
    kx, kp, key = jax.random.split(key, 3)
    x = jax.random.normal(kx, (B, I), dtype=jnp.float32)
    params = make_params(kp, I, N)
    df_r, mu_r, sg_r = reference_forward(x, *params)

    df, mu, sg = st_forward(x, *params)
    jax.block_until_ready((df, mu, sg))
    assert jnp.allclose(df, df_r, atol=1e-5, rtol=1e-5)
    assert jnp.allclose(mu, mu_r, atol=1e-5, rtol=1e-5)
    assert jnp.allclose(sg, sg_r, atol=1e-5, rtol=1e-5)

    # --- test 2: bf16 MXU-operand path (x cast inside the kernel) ------------
    df_b, mu_b, sg_b = st_forward(x, *params, matmul_dtype=jnp.bfloat16)
    jax.block_until_ready((df_b, mu_b, sg_b))
    assert jnp.allclose(df_b, df_r, atol=5e-2, rtol=5e-2)
    assert jnp.allclose(mu_b, mu_r, atol=5e-2, rtol=5e-2)
    assert jnp.allclose(sg_b, sg_r, atol=5e-2, rtol=5e-2)

    # --- test 3: K-tiled path + lane-aligned epilogue branch -----------------
    B2, I2, N2 = 16, 256, 64
    kx2, kp2, key = jax.random.split(key, 3)
    x2 = jax.random.normal(kx2, (B2, I2), dtype=jnp.float32)
    params2 = make_params(kp2, I2, N2)
    df2_r, mu2_r, sg2_r = reference_forward(x2, *params2)
    # force the K-tiling fallback by shrinking the weight-resident budget
    df2, mu2, sg2 = st_forward(x2, *params2, max_weight_bytes=300 * 1024)
    jax.block_until_ready((df2, mu2, sg2))
    assert jnp.allclose(df2, df2_r, atol=1e-4, rtol=1e-4)
    assert jnp.allclose(mu2, mu2_r, atol=1e-4, rtol=1e-4)
    assert jnp.allclose(sg2, sg2_r, atol=1e-4, rtol=1e-4)

    print("KERNEL_OK")
</pallas_src>

<mosaic_0001>
module attributes {stable_mosaic.version = 11 : i64} {
  func.func @st_kernel(%arg0: i32, %arg1: memref<8x32xf32, #tpu.memory_space<vmem>>, %arg2: memref<32x128xf32, #tpu.memory_space<vmem>>, %arg3: memref<1x128xf32, #tpu.memory_space<vmem>>, %arg4: memref<8x128xf32, #tpu.memory_space<vmem>>) attributes {dimension_semantics = [#tpu.dimension_semantics<parallel>], iteration_bounds = array<i64: 1>, scalar_prefetch = 0 : i64, scratch_operands = 0 : i64, tpu.core_type = #tpu.core_type<tc>, window_params = [{transform_indices = @transform_0, window_bounds = array<i64: 8, 32>}, {pipeline_mode = #tpu.pipeline_mode<synchronous>, transform_indices = @transform_1, window_bounds = array<i64: 32, 128>}, {pipeline_mode = #tpu.pipeline_mode<synchronous>, transform_indices = @transform_2, window_bounds = array<i64: 1, 128>}, {transform_indices = @transform_3, window_bounds = array<i64: 8, 128>}]} {
    %c0 = arith.constant 0 : index
    %c0_0 = arith.constant 0 : index
    %0 = vector.load %arg1[%c0, %c0_0] : memref<8x32xf32, #tpu.memory_space<vmem>>, vector<8x32xf32>
    %c0_1 = arith.constant 0 : index
    %c0_2 = arith.constant 0 : index
    %1 = vector.load %arg2[%c0_1, %c0_2] : memref<32x128xf32, #tpu.memory_space<vmem>>, vector<32x128xf32>
    %cst = arith.constant dense<0.000000e+00> : vector<8x128xf32>
    %2 = tpu.matmul %0, %1, %cst {dimension_numbers = #tpu.dot_dimension_numbers<[1], [0], [0], [1], [0, 0, 1, 1], [], []>} : vector<8x32xf32>, vector<32x128xf32>, vector<8x128xf32> -> vector<8x128xf32>
    %c0_3 = arith.constant 0 : index
    %c0_4 = arith.constant 0 : index
    %3 = vector.load %arg3[%c0_3, %c0_4] : memref<1x128xf32, #tpu.memory_space<vmem>>, vector<1x128xf32>
    %4 = vector.broadcast %3 : vector<1x128xf32> to vector<8x128xf32>
    %5 = arith.addf %2, %4 : vector<8x128xf32>
    %6 = tpu.iota {dimensions = array<i32: 1>} : vector<8x128xi32>
    %c64_i32 = arith.constant 64 : i32
    %7 = vector.broadcast %c64_i32 : i32 to vector<8x128xi32>
    %8 = arith.cmpi slt, %6, %7 : vector<8x128xi32>
    %9 = math.exp %5 : vector<8x128xf32>
    %10 = arith.select %8, %9, %5 : vector<8x128xi1>, vector<8x128xf32>
    %c0_5 = arith.constant 0 : index
    %c0_6 = arith.constant 0 : index
    %11 = vector.load %arg4[%c0_5, %c0_6] : memref<8x128xf32, #tpu.memory_space<vmem>>, vector<8x128xf32>
    tpu.vector_store %arg4[%c0_5, %c0_6], %10 {strides = array<i32>} : memref<8x128xf32, #tpu.memory_space<vmem>>, vector<8x128xf32>,
    return
  }
  func.func @transform_0(%arg0: i32) -> (i32, i32) {
    %c0_i32 = arith.constant 0 : i32
    %c0_i32_0 = arith.constant 0 : i32
    return %arg0, %c0_i32 : i32, i32
  }
  func.func @transform_1(%arg0: i32) -> (i32, i32) {
    %c0_i32 = arith.constant 0 : i32
    %c0_i32_0 = arith.constant 0 : i32
    %c0_i32_1 = arith.constant 0 : i32
    return %c0_i32, %c0_i32_0 : i32, i32
  }
  func.func @transform_2(%arg0: i32) -> (i32, i32) {
    %c0_i32 = arith.constant 0 : i32
    %c0_i32_0 = arith.constant 0 : i32
    %c0_i32_1 = arith.constant 0 : i32
    return %c0_i32, %c0_i32_0 : i32, i32
  }
  func.func @transform_3(%arg0: i32) -> (i32, i32) {
    %c0_i32 = arith.constant 0 : i32
    %c0_i32_0 = arith.constant 0 : i32
    return %arg0, %c0_i32 : i32, i32
  }
}

</mosaic_0001>

<bundles_post_ra>
// kernel: tpu_custom_call.1
= control target key start
LH: loop header
LB: loop body
LE: loop exit
PB: predicated region body
PF: predicated region fallthrough
CT: control target
= control target key end

     0   :  { %8 = vsyncpa [#allocation3], 0  ;;  %s330_s0 = inlined_call_operand.hbm [shape: f32[8,32], index: 0, kind: input, shape index: {}]   ;;  %s331_s1 = inlined_call_operand.hbm [shape: f32[32,128], index: 1, kind: input, shape index: {}]   ;;  %s332_s2 = inlined_call_operand.vmem [shape: f32[1,128], index: 2, kind: input, shape index: {}]   ;;  %s333_s3 = inlined_call_operand.hbm [shape: f32[8,128], index: 3, kind: output, shape index: {}]  }
   0x1   :  { %9 = vsyncpa [#allocation6], 0 }
   0x2   :  { %10 = vsyncpa [#allocation4], 0  ;;  %s256_s12 = smov [#allocation2]   ;;  %s257_s14 = smov [#allocation5]  }
   0x3   :  { %s17_s13 = sshll.u32 %s256_s12, 4  ;;  %s26_s15 = sshll.u32 %s257_s14, 4  ;;  %s18_s13 = int_to_ptr.vmem [resolvable:$true] %s17_s13  ;;  %s284_s15 = int_to_ptr.vmem [resolvable:$true] %s26_s15 }
   0x4   :  { %s184_s18 = scalar_lea.hbm %s330_s0, 128 }
   0x5   :  { %p185_p0 = scmp.ne.s32.totalorder %s330_s0, %s184_s18  ;;  %p188_p1 = scmp.lt.u32.totalorder %s184_s18, %s330_s0 }
   0x7   :  { %p190_p2 = pnand %p188_p1, %p185_p0 }
   0x9   :  { %193 = shalt.err (!%p190_p2)
}
   0xa   :  { %s194_s23 = scalar_lea.vmem %s18_s13, 128  ;;  %p199_p4 = scmp.lt.s32.totalorder %s18_s13, %s18_s13 }
   0xb   :  { %p195_p3 = scmp.ne.s32.totalorder %s18_s13, %s194_s23  ;;  %p200_p5 = scmp.lt.s32.totalorder %s194_s23, %s194_s23 }
   0xd   :  { %p201_p6 = por %p200_p5, %p199_p4 }
   0xf   :  { %p202_p7 = pnand %p201_p6, %p195_p3 }
  0x11   :  { %205 = shalt.err (!%p202_p7)
}
  0x12   :  { %20 = dma.hbm_to_vmem [thread:$0]  %s330_s0, 128, %s18_s13, [#allocation3]  }
  0x13   :  { %s206_s28 = scalar_lea.hbm %s331_s1, 512 }
  0x14   :  { %p207_p8 = scmp.ne.s32.totalorder %s331_s1, %s206_s28  ;;  %p210_p9 = scmp.lt.u32.totalorder %s206_s28, %s331_s1 }
  0x16   :  { %p212_p10 = pnand %p210_p9, %p207_p8 }
  0x18   :  { %215 = shalt.err (!%p212_p10)
}
  0x19   :  { %s216_s6 = scalar_lea.vmem %s284_s15, 512  ;;  %p221_p12 = scmp.lt.s32.totalorder %s284_s15, %s284_s15 }
  0x1a   :  { %p217_p11 = scmp.ne.s32.totalorder %s284_s15, %s216_s6  ;;  %p222_p13 = scmp.lt.s32.totalorder %s216_s6, %s216_s6 }
  0x1c   :  { %p223_p0 = por %p222_p13, %p221_p12 }
  0x1e   :  { %p224_p1 = pnand %p223_p0, %p217_p11 }
  0x20   :  { %227 = shalt.err (!%p224_p1)
}
  0x21   :  { %s258_s0 = smov 128   ;;  %s259_s7 = smov 8  }
  0x22   :  { %32 = dma.hbm_to_vmem [thread:$0]  %s331_s1, 512, %s284_s15, [#allocation6], %s258_s0, %s258_s0, %s259_s7  }
  0x23   :  { %250 = dma.done.wait [#allocation3], 128  }
  0x24   :  { %251 = vsyncadd [#allocation3], 4294967168 }
  0x25   :  { %252 = dma.done.wait [#allocation6], 512  }
  0x26   :  { %253 = vsyncadd [#allocation6], 4294966784  ;;  %v260_v0 = vmov 0.0|0.0   ;;  %vm261_vm0 = vmmov 0   ;;  %v262_v1 = vmov 0.0   ;;  %v42_v2 = vld [vmem:[#allocation5] sm:$0xff]  ;;  %v127_v14 = vlaneseq }
  0x27   :  { %168 = vmatprep.subr.bf16.mxu0 %v260_v0  ;;  %165 = vmatprep.mubr.msk.f32.mxu0 %vm261_vm0, %v262_v1  ;;  %v43_v3 = vld [vmem:[#allocation5 + $0x8] sm:$0xff]  ;;  %v44_v4 = vld [vmem:[#allocation5 + $0x10] sm:$0xff]  ;;  %v45_v6 = vld [vmem:[#allocation5 + $0x18] sm:$0xff]  ;;  %vm53_vm1 = vcmask 261120   ;;  %s263_s11 = smov [#allocation7]  }
  0x28   :  { %v169_v5 = vpack.c.bf16 %v43_v3, %v42_v2  ;;  %v172_v7 = vpack.c.bf16 %v45_v6, %v44_v4  ;;  %v41_v8 = vld [vmem:[#allocation2] sm:$0xff]  ;;  %v128_v15 = vand.u32 127, %v127_v14  ;;  %s140_s12 = sshll.u32 %s263_s11, 4  ;;  %s141_s12 = int_to_ptr.vmem [resolvable:$true] %s140_s12 }
  0x29   :  { %v150_v9 = vld [vmem:[%s332_s2] ss:$0 sm:$0xff]  ;;  %s228_s13 = scalar_lea.vmem %s141_s12, 128  ;;  %p233_p3 = scmp.lt.s32.totalorder %s141_s12, %s141_s12 }
  0x2a   :  { %170 = vmatpush3.bf16.msra.mxu0 %v169_v5  ;;  %vm129_vm2 = vcmp.lt.s32.totalorder %v128_v15, 64  ;;  %p229_p2 = scmp.ne.s32.totalorder %s141_s12, %s228_s13  ;;  %p234_p4 = scmp.lt.s32.totalorder %s228_s13, %s228_s13 }
  0x2b   :  { %171 = vmatprep.subr.bf16.mxu0 %v260_v0 }
  0x2c   :  { %p235_p5 = por %p234_p4, %p233_p3 }
  0x2e   :  { %173 = vmatpush3.bf16.msra.mxu0 %v172_v7  ;;  %p236_p6 = pnand %p235_p5, %p229_p2 }
  0x31   :  { %166 = vmatmul.mubr.msk.f32.vlgmr.msra.gmra.mrb[0].mxu0 %vm53_vm1, %v41_v8 }
 0x104   :  { %v123_v10 = vpop.f32.mrb[0].mxu0 }
 0x105   :  { %v124_v11 = vadd.f32 %v150_v9, %v123_v10  ;;  %v167_v12 = vpop.f32.mrb[1].mxu0 }
 0x107   :  { %v130_v13 = vmul.f32 1.442695, %v124_v11 }
 0x109   :  { %182 = vpow2.f32 %v130_v13 }
 0x113   :  { %v183_v16 = vpop.eup %182 }
 0x114   :  { %v132_v17 = vsel %vm129_vm2, %v183_v16, %v124_v11 }
 0x115   :  { %133 = vst [vmem:[#allocation7] sm:$0xff] %v132_v17 }
 0x116   :  { %239 = shalt.err (!%p236_p6)
}
 0x117   :  { %s240_s15 = scalar_lea.hbm %s333_s3, 128 }
 0x118   :  { %p241_p7 = scmp.ne.s32.totalorder %s333_s3, %s240_s15  ;;  %p244_p8 = scmp.lt.u32.totalorder %s240_s15, %s333_s3 }
 0x11a   :  { %p246_p9 = pnand %p244_p8, %p241_p7 }
 0x11c   :  { %249 = shalt.err (!%p246_p9)
}
 0x11d   :  { %143 = dma.vmem_to_hbm [thread:$0]  %s141_s12, 128, %s333_s3, [#allocation4]  }
 0x11e   :  { %254 = dma.done.wait [#allocation4], 128  }
 0x11f   :  { %255 = vsyncadd [#allocation4], 4294967168 }
 0x120   :  { %147 = vsyncpa [#allocation3], 1 }
 0x121   :  { %148 = vsyncpa [#allocation6], 1 }
 0x122   :  { %149 = vsyncpa [#allocation4], 1 }

</bundles_post_ra>
